<compile_context>
chip_gen: v5e
topology: v5e:2x2
jax: 0.10.0
libtpu: 0.0.40
codegen_flags: <defaults>
</compile_context>

<pallas_src>
import jax
import jax.numpy as jnp
from jax import lax
from jax.experimental import pallas as pl
from jax.experimental.pallas import tpu as pltpu


# ---------------- small test shapes consistent with the module ------------------
N_EMBD    = 32     # C  (module uses 384; scaled down for the test harness)
NUM_HEADS = 4      # H
HEAD_SIZE = 8      # hs
SEQ_LEN   = 8      # T  (<= context_length)
BATCH     = 2      # B

_NEG = -1e30       # finite causal-mask fill (no inf-inf NaN risk); safe in f32/bf16


def _mha_kernel(x_ref, wq_ref, wk_ref, wv_ref, wp_ref, bp_ref, o_ref):
    """One (batch, head) grid step.

    x_ref  : (1, T, C)   f32   one batch element's activations (resident across heads)
    wq_ref : (1, C, hs)  bf16  this head's Q weights (softmax scale pre-folded)
    wk_ref : (1, C, hs)  bf16  this head's K weights
    wv_ref : (1, C, hs)  bf16  this head's V weights
    wp_ref : (1, hs, Cp) bf16  this head's rows of the output projection (lane-padded)
    bp_ref : (1, Cp)     f32   output projection bias (lane-padded)
    o_ref  : (1, T, Cp)  f32   output block, accumulated in-place across heads
    """
    h = pl.program_id(1)
    _, T, Cp = o_ref.shape

    xb = x_ref[0].astype(jnp.bfloat16)                                   # (T, C)

    # Per-head projections: bf16 MXU operands, f32 accumulation.
    q = jnp.dot(xb, wq_ref[0], preferred_element_type=jnp.float32)       # (T, hs)
    k = jnp.dot(xb, wk_ref[0], preferred_element_type=jnp.float32)
    v = jnp.dot(xb, wv_ref[0], preferred_element_type=jnp.float32)

    # Scores: contract the last dims of q and k directly (no k.T relayout copy).
    s = lax.dot_general(q.astype(jnp.bfloat16), k.astype(jnp.bfloat16),
                        dimension_numbers=(((1,), (1,)), ((), ())),
                        preferred_element_type=jnp.float32)              # (T, T)

    # Causal additive bias (0 / -1e30).
    row = lax.broadcasted_iota(jnp.int32, (T, T), 0)
    col = lax.broadcasted_iota(jnp.int32, (T, T), 1)
    s = s + jnp.where(col <= row, 0.0, _NEG)

    # f32 softmax: max-subtraction + exp + approx EUP reciprocal (frees VALU slot).
    s = s - jnp.max(s, axis=-1, keepdims=True)
    p = jnp.exp(s)
    p = p * pl.reciprocal(jnp.sum(p, axis=-1, keepdims=True), approx=True)
    # TODO(synk): attention dropout omitted (eval-mode identity).

    pv = jnp.dot(p.astype(jnp.bfloat16), v.astype(jnp.bfloat16),
                 preferred_element_type=jnp.float32)                     # (T, hs)

    # This head's contribution to the output projection (accumulate in the
    # resident output block -> no lane concat of 8-wide head outputs).
    contrib = jnp.dot(pv.astype(jnp.bfloat16), wp_ref[0],
                      preferred_element_type=jnp.float32)                # (T, Cp)

    @pl.when(h == 0)
    def _init():
        o_ref[0] = jnp.broadcast_to(bp_ref[...], (T, Cp))

    o_ref[0] = o_ref[0] + contrib
    # TODO(synk): output dropout omitted (eval-mode identity).
    # TODO(synk): at production size (C=384, T up to 256+) add a kv-tile grid axis
    #             (flash-style running max/sum accumulator), use 256-aligned q/kv
    #             tiles on v6e/v7x, and set vmem_limit_bytes for v7x's 64 MiB VMEM.


def _round_up(n, m):
    return ((n + m - 1) // m) * m


def prepare_mha_params(wq_t, wk_t, wv_t, wp_t, bp, n_embd):
    """One-time host-side weight prep (legitimate: done once, not per call):
    fold softmax scale into Q, head-major layouts, bf16 matmul weights,
    lane-pad the output projection / bias to a multiple of 128 lanes."""
    H, C, hs = wq_t.shape
    Cp = _round_up(n_embd, 128)
    scale = n_embd ** (-0.5)   # module uses C**-0.5 (NOT hs**-0.5) -- intentional
    wq_hm = (wq_t * scale).astype(jnp.bfloat16)                          # (H, C, hs)
    wk_hm = wk_t.astype(jnp.bfloat16)
    wv_hm = wv_t.astype(jnp.bfloat16)
    wp_hm = (jnp.zeros((H, hs, Cp), jnp.float32)
             .at[:, :, :n_embd].set(wp_t.reshape(H, hs, n_embd))
             .astype(jnp.bfloat16))                                      # (H, hs, Cp)
    bp_pad = jnp.zeros((1, Cp), jnp.float32).at[:, :n_embd].set(bp)      # (1, Cp)
    return wq_hm, wk_hm, wv_hm, wp_hm, bp_pad


def multi_head_attention(x, wq_hm, wk_hm, wv_hm, wp_hm, bp_pad):
    """x: (B, T, C) f32 -> (B, T, C) f32 (eval-mode forward)."""
    B, T, C = x.shape
    H, _, hs = wq_hm.shape
    Cp = wp_hm.shape[-1]

    out = pl.pallas_call(
        _mha_kernel,
        out_shape=jax.ShapeDtypeStruct((B, T, Cp), jnp.float32),
        grid_spec=pltpu.PrefetchScalarGridSpec(
            num_scalar_prefetch=0,
            grid=(B, H),                       # head (reduction) axis last / innermost
            in_specs=[
                pl.BlockSpec((1, T, C),   lambda b, h: (b, 0, 0)),  # x (resident over h)
                pl.BlockSpec((1, C, hs),  lambda b, h: (h, 0, 0)),  # Wq (scale folded)
                pl.BlockSpec((1, C, hs),  lambda b, h: (h, 0, 0)),  # Wk
                pl.BlockSpec((1, C, hs),  lambda b, h: (h, 0, 0)),  # Wv
                pl.BlockSpec((1, hs, Cp), lambda b, h: (h, 0, 0)),  # Wproj rows, head h
                pl.BlockSpec((1, Cp),     lambda b, h: (0, 0)),     # bproj
            ],
            out_specs=pl.BlockSpec((1, T, Cp), lambda b, h: (b, 0, 0)),
        ),
        compiler_params=pltpu.CompilerParams(
            # batch axis parallel -> both v7x TensorCores; head axis is the
            # output-projection accumulation (output block revisited).
            dimension_semantics=("parallel", "arbitrary")),
    )(x, wq_hm, wk_hm, wv_hm, wp_hm, bp_pad)

    return out[:, :, :C]   # drop lane padding (no-op at production C=384)


def _reference(x, wq_t, wk_t, wv_t, wp_t, bp):
    """Pure-JAX f32 reference mirroring the PyTorch forward (eval mode)."""
    B, T, C = x.shape
    H = wq_t.shape[0]
    outs = []
    mask = jnp.tril(jnp.ones((T, T), dtype=bool))
    for h in range(H):
        q = x @ wq_t[h]
        k = x @ wk_t[h]
        v = x @ wv_t[h]
        wei = (q @ jnp.swapaxes(k, -2, -1)) * (C ** -0.5)
        wei = jnp.where(mask, wei, -jnp.inf)
        wei = jax.nn.softmax(wei, axis=-1)
        outs.append(wei @ v)
    cat = jnp.concatenate(outs, axis=-1)
    return cat @ wp_t + bp


if __name__ == "__main__":
    key = jax.random.PRNGKey(0)
    kx, kq, kk, kv, kp, kb = jax.random.split(key, 6)

    B, T, C, H, hs = BATCH, SEQ_LEN, N_EMBD, NUM_HEADS, HEAD_SIZE

    x = jax.random.normal(kx, (B, T, C), dtype=jnp.float32)

    # deterministic parameter init (PyTorch nn.Linear-style uniform bounds)
    lim_in  = 1.0 / (C ** 0.5)          # key/query/value: in_features = n_embd
    lim_prj = 1.0 / ((H * hs) ** 0.5)   # proj: in_features = H * hs

    # Linear weights stored already transposed for `x @ W^T`:
    wq_t = jax.random.uniform(kq, (H, C, hs), jnp.float32, -lim_in, lim_in)
    wk_t = jax.random.uniform(kk, (H, C, hs), jnp.float32, -lim_in, lim_in)
    wv_t = jax.random.uniform(kv, (H, C, hs), jnp.float32, -lim_in, lim_in)
    wp_t = jax.random.uniform(kp, (H * hs, C), jnp.float32, -lim_prj, lim_prj)
    bp   = jax.random.uniform(kb, (1, C), jnp.float32, -lim_prj, lim_prj)

    # One-time weight prep (head-major, bf16, scale folded into Q, lane-padded proj).
    wq_hm, wk_hm, wv_hm, wp_hm, bp_pad = prepare_mha_params(
        wq_t, wk_t, wv_t, wp_t, bp, C)

    out = multi_head_attention(x, wq_hm, wk_hm, wv_hm, wp_hm, bp_pad)
    out = jax.block_until_ready(out)

    ref = _reference(x, wq_t, wk_t, wv_t, wp_t, bp)
    assert out.shape == (B, T, C)
    # tolerance accounts for bf16 MXU operands (f32 accumulation) + approx EUP
    # reciprocal; softmax math itself is kept in f32.
    assert jnp.allclose(out, ref, rtol=2e-2, atol=2e-2), "mismatch vs JAX reference"

    print("KERNEL_OK")
</pallas_src>

<mosaic_0001>
module attributes {stable_mosaic.version = 11 : i64} {
  func.func @_mha_kernel(%arg0: i32, %arg1: i32, %arg2: memref<1x8x32xf32, #tpu.memory_space<vmem>>, %arg3: memref<1x32x8xbf16, #tpu.memory_space<vmem>>, %arg4: memref<1x32x8xbf16, #tpu.memory_space<vmem>>, %arg5: memref<1x32x8xbf16, #tpu.memory_space<vmem>>, %arg6: memref<1x8x128xbf16, #tpu.memory_space<vmem>>, %arg7: memref<1x128xf32, #tpu.memory_space<vmem>>, %arg8: memref<1x8x128xf32, #tpu.memory_space<vmem>>) attributes {dimension_semantics = [#tpu.dimension_semantics<parallel>, #tpu.dimension_semantics<arbitrary>], iteration_bounds = array<i64: 2, 4>, scalar_prefetch = 0 : i64, scratch_operands = 0 : i64, tpu.core_type = #tpu.core_type<tc>, window_params = [{transform_indices = @transform_0, window_bounds = array<i64: 1, 8, 32>}, {transform_indices = @transform_1, window_bounds = array<i64: 1, 32, 8>}, {transform_indices = @transform_2, window_bounds = array<i64: 1, 32, 8>}, {transform_indices = @transform_3, window_bounds = array<i64: 1, 32, 8>}, {transform_indices = @transform_4, window_bounds = array<i64: 1, 8, 128>}, {pipeline_mode = #tpu.pipeline_mode<synchronous>, transform_indices = @transform_5, window_bounds = array<i64: 1, 128>}, {transform_indices = @transform_6, window_bounds = array<i64: 1, 8, 128>}]} {
    %c0 = arith.constant 0 : index
    %c0_0 = arith.constant 0 : index
    %c0_1 = arith.constant 0 : index
    %0 = vector.load %arg2[%c0, %c0_0, %c0_1] : memref<1x8x32xf32, #tpu.memory_space<vmem>>, vector<1x8x32xf32>
    %1 = vector.shape_cast %0 : vector<1x8x32xf32> to vector<8x32xf32>
    %2 = arith.truncf %1 : vector<8x32xf32> to vector<8x32xbf16>
    %c0_2 = arith.constant 0 : index
    %c0_3 = arith.constant 0 : index
    %c0_4 = arith.constant 0 : index
    %3 = vector.load %arg3[%c0_2, %c0_3, %c0_4] : memref<1x32x8xbf16, #tpu.memory_space<vmem>>, vector<1x32x8xbf16>
    %4 = vector.shape_cast %3 : vector<1x32x8xbf16> to vector<32x8xbf16>
    %cst = arith.constant dense<0.000000e+00> : vector<8x8xf32>
    %5 = tpu.matmul %2, %4, %cst {dimension_numbers = #tpu.dot_dimension_numbers<[1], [0], [0], [1], [0, 0, 1, 1], [], []>} : vector<8x32xbf16>, vector<32x8xbf16>, vector<8x8xf32> -> vector<8x8xf32>
    %c0_5 = arith.constant 0 : index
    %c0_6 = arith.constant 0 : index
    %c0_7 = arith.constant 0 : index
    %6 = vector.load %arg4[%c0_5, %c0_6, %c0_7] : memref<1x32x8xbf16, #tpu.memory_space<vmem>>, vector<1x32x8xbf16>
    %7 = vector.shape_cast %6 : vector<1x32x8xbf16> to vector<32x8xbf16>
    %cst_8 = arith.constant dense<0.000000e+00> : vector<8x8xf32>
    %8 = tpu.matmul %2, %7, %cst_8 {dimension_numbers = #tpu.dot_dimension_numbers<[1], [0], [0], [1], [0, 0, 1, 1], [], []>} : vector<8x32xbf16>, vector<32x8xbf16>, vector<8x8xf32> -> vector<8x8xf32>
    %c0_9 = arith.constant 0 : index
    %c0_10 = arith.constant 0 : index
    %c0_11 = arith.constant 0 : index
    %9 = vector.load %arg5[%c0_9, %c0_10, %c0_11] : memref<1x32x8xbf16, #tpu.memory_space<vmem>>, vector<1x32x8xbf16>
    %10 = vector.shape_cast %9 : vector<1x32x8xbf16> to vector<32x8xbf16>
    %cst_12 = arith.constant dense<0.000000e+00> : vector<8x8xf32>
    %11 = tpu.matmul %2, %10, %cst_12 {dimension_numbers = #tpu.dot_dimension_numbers<[1], [0], [0], [1], [0, 0, 1, 1], [], []>} : vector<8x32xbf16>, vector<32x8xbf16>, vector<8x8xf32> -> vector<8x8xf32>
    %12 = arith.truncf %5 : vector<8x8xf32> to vector<8x8xbf16>
    %13 = arith.truncf %8 : vector<8x8xf32> to vector<8x8xbf16>
    %cst_13 = arith.constant dense<0.000000e+00> : vector<8x8xf32>
    %14 = tpu.matmul %12, %13, %cst_13 {dimension_numbers = #tpu.dot_dimension_numbers<[1], [1], [0], [0], [0, 0, 1, 0], [], []>} : vector<8x8xbf16>, vector<8x8xbf16>, vector<8x8xf32> -> vector<8x8xf32>
    %15 = tpu.iota {dimensions = array<i32: 0>} : vector<8x8xi32>
    %16 = tpu.iota {dimensions = array<i32: 1>} : vector<8x8xi32>
    %17 = arith.cmpi sle, %16, %15 : vector<8x8xi32>
    %cst_14 = arith.constant 0.000000e+00 : f32
    %cst_15 = arith.constant -1.000000e+30 : f32
    %18 = vector.broadcast %cst_14 : f32 to vector<8x8xf32>
    %19 = vector.broadcast %cst_15 : f32 to vector<8x8xf32>
    %20 = arith.select %17, %18, %19 : vector<8x8xi1>, vector<8x8xf32>
    %21 = arith.addf %14, %20 : vector<8x8xf32>
    %cst_16 = arith.constant dense<0xFF800000> : vector<8xf32>
    %22 = vector.multi_reduction <maximumf>, %21, %cst_16 [1] : vector<8x8xf32> to vector<8xf32>
    %23 = vector.shape_cast %22 : vector<8xf32> to vector<8x1xf32>
    %24 = vector.broadcast %23 : vector<8x1xf32> to vector<8x8xf32>
    %25 = arith.subf %21, %24 : vector<8x8xf32>
    %26 = math.exp %25 : vector<8x8xf32>
    %cst_17 = arith.constant dense<0.000000e+00> : vector<8xf32>
    %27 = vector.multi_reduction <add>, %26, %cst_17 [1] : vector<8x8xf32> to vector<8xf32>
    %28 = vector.shape_cast %27 : vector<8xf32> to vector<8x1xf32>
    %29 = tpu.reciprocal %28 {approx = true} : vector<8x1xf32> -> vector<8x1xf32>
    %30 = vector.broadcast %29 : vector<8x1xf32> to vector<8x8xf32>
    %31 = arith.mulf %26, %30 : vector<8x8xf32>
    %32 = arith.truncf %31 : vector<8x8xf32> to vector<8x8xbf16>
    %33 = arith.truncf %11 : vector<8x8xf32> to vector<8x8xbf16>
    %cst_18 = arith.constant dense<0.000000e+00> : vector<8x8xf32>
    %34 = tpu.matmul %32, %33, %cst_18 {dimension_numbers = #tpu.dot_dimension_numbers<[1], [0], [0], [1], [0, 0, 1, 1], [], []>} : vector<8x8xbf16>, vector<8x8xbf16>, vector<8x8xf32> -> vector<8x8xf32>
    %35 = arith.truncf %34 : vector<8x8xf32> to vector<8x8xbf16>
    %c0_19 = arith.constant 0 : index
    %c0_20 = arith.constant 0 : index
    %c0_21 = arith.constant 0 : index
    %36 = vector.load %arg6[%c0_19, %c0_20, %c0_21] : memref<1x8x128xbf16, #tpu.memory_space<vmem>>, vector<1x8x128xbf16>
    %37 = vector.shape_cast %36 : vector<1x8x128xbf16> to vector<8x128xbf16>
    %cst_22 = arith.constant dense<0.000000e+00> : vector<8x128xf32>
    %38 = tpu.matmul %35, %37, %cst_22 {dimension_numbers = #tpu.dot_dimension_numbers<[1], [0], [0], [1], [0, 0, 1, 1], [], []>} : vector<8x8xbf16>, vector<8x128xbf16>, vector<8x128xf32> -> vector<8x128xf32>
    %c0_i32 = arith.constant 0 : i32
    %39 = arith.cmpi eq, %arg1, %c0_i32 : i32
    %40 = arith.extui %39 : i1 to i32
    %c0_i32_23 = arith.constant 0 : i32
    %41 = arith.cmpi ne, %40, %c0_i32_23 : i32
    scf.if %41 {
      %c0_30 = arith.constant 0 : index
      %c0_31 = arith.constant 0 : index
      %48 = vector.load %arg7[%c0_30, %c0_31] : memref<1x128xf32, #tpu.memory_space<vmem>>, vector<1x128xf32>
      %49 = vector.shape_cast %48 : vector<1x128xf32> to vector<1x128xf32>
      %50 = vector.broadcast %49 : vector<1x128xf32> to vector<8x128xf32>
      %c0_32 = arith.constant 0 : index
      %c0_33 = arith.constant 0 : index
      %c0_34 = arith.constant 0 : index
      %51 = vector.load %arg8[%c0_32, %c0_33, %c0_34] : memref<1x8x128xf32, #tpu.memory_space<vmem>>, vector<1x8x128xf32>
      %52 = vector.shape_cast %51 : vector<1x8x128xf32> to vector<8x128xf32>
      %53 = vector.shape_cast %50 : vector<8x128xf32> to vector<1x8x128xf32>
      tpu.vector_store %arg8[%c0_32, %c0_33, %c0_34], %53 {strides = array<i32>} : memref<1x8x128xf32, #tpu.memory_space<vmem>>, vector<1x8x128xf32>,
    } else {
    }
    %c0_24 = arith.constant 0 : index
    %c0_25 = arith.constant 0 : index
    %c0_26 = arith.constant 0 : index
    %42 = vector.load %arg8[%c0_24, %c0_25, %c0_26] : memref<1x8x128xf32, #tpu.memory_space<vmem>>, vector<1x8x128xf32>
    %43 = vector.shape_cast %42 : vector<1x8x128xf32> to vector<8x128xf32>
    %44 = arith.addf %43, %38 : vector<8x128xf32>
    %c0_27 = arith.constant 0 : index
    %c0_28 = arith.constant 0 : index
    %c0_29 = arith.constant 0 : index
    %45 = vector.load %arg8[%c0_27, %c0_28, %c0_29] : memref<1x8x128xf32, #tpu.memory_space<vmem>>, vector<1x8x128xf32>
    %46 = vector.shape_cast %45 : vector<1x8x128xf32> to vector<8x128xf32>
    %47 = vector.shape_cast %44 : vector<8x128xf32> to vector<1x8x128xf32>
    tpu.vector_store %arg8[%c0_27, %c0_28, %c0_29], %47 {strides = array<i32>} : memref<1x8x128xf32, #tpu.memory_space<vmem>>, vector<1x8x128xf32>,
    return
  }
  func.func @transform_0(%arg0: i32, %arg1: i32) -> (i32, i32, i32) {
    %c0_i32 = arith.constant 0 : i32
    %c0_i32_0 = arith.constant 0 : i32
    %c0_i32_1 = arith.constant 0 : i32
    return %arg0, %c0_i32, %c0_i32_0 : i32, i32, i32
  }
  func.func @transform_1(%arg0: i32, %arg1: i32) -> (i32, i32, i32) {
    %c0_i32 = arith.constant 0 : i32
    %c0_i32_0 = arith.constant 0 : i32
    %c0_i32_1 = arith.constant 0 : i32
    return %arg1, %c0_i32, %c0_i32_0 : i32, i32, i32
  }
  func.func @transform_2(%arg0: i32, %arg1: i32) -> (i32, i32, i32) {
    %c0_i32 = arith.constant 0 : i32
    %c0_i32_0 = arith.constant 0 : i32
    %c0_i32_1 = arith.constant 0 : i32
    return %arg1, %c0_i32, %c0_i32_0 : i32, i32, i32
  }
  func.func @transform_3(%arg0: i32, %arg1: i32) -> (i32, i32, i32) {
    %c0_i32 = arith.constant 0 : i32
    %c0_i32_0 = arith.constant 0 : i32
    %c0_i32_1 = arith.constant 0 : i32
    return %arg1, %c0_i32, %c0_i32_0 : i32, i32, i32
  }
  func.func @transform_4(%arg0: i32, %arg1: i32) -> (i32, i32, i32) {
    %c0_i32 = arith.constant 0 : i32
    %c0_i32_0 = arith.constant 0 : i32
    %c0_i32_1 = arith.constant 0 : i32
    return %arg1, %c0_i32, %c0_i32_0 : i32, i32, i32
  }
  func.func @transform_5(%arg0: i32, %arg1: i32) -> (i32, i32) {
    %c0_i32 = arith.constant 0 : i32
    %c0_i32_0 = arith.constant 0 : i32
    %c0_i32_1 = arith.constant 0 : i32
    return %c0_i32, %c0_i32_0 : i32, i32
  }
  func.func @transform_6(%arg0: i32, %arg1: i32) -> (i32, i32, i32) {
    %c0_i32 = arith.constant 0 : i32
    %c0_i32_0 = arith.constant 0 : i32
    %c0_i32_1 = arith.constant 0 : i32
    return %arg0, %c0_i32, %c0_i32_0 : i32, i32, i32
  }
}

</mosaic_0001>

<bundles_post_ra>
// kernel: tpu_custom_call.1
= control target key start
LH: loop header
LB: loop body
LE: loop exit
PB: predicated region body
PF: predicated region fallthrough
CT: control target
= control target key end

     0   :  { %11 = vsyncpa [#allocation3], 0  ;;  %s1080_s0 = inlined_call_operand.vmem [shape: f32[2,8,32], index: 0, kind: input, shape index: {}]   ;;  %s1081_s1 = inlined_call_operand.vmem [shape: bf16[4,32,8], index: 1, kind: input, shape index: {}]   ;;  %s1082_s2 = inlined_call_operand.vmem [shape: bf16[4,32,8], index: 2, kind: input, shape index: {}]   ;;  %s1083_s3 = inlined_call_operand.vmem [shape: bf16[4,32,8], index: 3, kind: input, shape index: {}]   ;;  %s1084_s4 = inlined_call_operand.vmem [shape: bf16[4,8,128], index: 4, kind: input, shape index: {}]   ;;  %s1085_s5 = inlined_call_operand.vmem [shape: f32[1,128], index: 5, kind: input, shape index: {}]   ;;  %s1086_s6 = inlined_call_operand.hbm [shape: f32[2,8,128], index: 6, kind: output, shape index: {}]  }
   0x1   :  { %13 = vsyncpa [#allocation3 + $0x1], 0  ;;  %s925_s21 = smov 0   ;;  %s927_s22 = smov 0  }
   0x2   :  { %s929_s23 = smov 0   ;;  %s931_s24 = smov 0  }
   0x3   :  { %s933_s25 = smov 0   ;;  %s935_s26 = smov 0  }
   0x4   :  { %s937_s27 = smov 0   ;;  %s939_s28 = smov 0  }
   0x5 LB: > { %1090 = sst [smem:[#allocation5_spill]] %s883_s27  ;;  %s658_s29 = sadd.s32 4294967295, %s887_s28   ;;  %s887_s28 = sphi %s939_s28, %s19_s28   ;;  %s883_s27 = sphi %s937_s27, %s1098_s27   ;;  %s879_s26 = sphi %s935_s26, %s1103_s26   ;;  %s875_s25 = sphi %s933_s25, %s1096_s25   ;;  %s871_s24 = sphi %s931_s24, %s1102_s24   ;;  %s867_s23 = sphi %s929_s23, %s1101_s23   ;;  %s863_s22 = sphi %s927_s22, %s1100_s22   ;;  %s859_s21 = sphi %s925_s21, %s1099_s21  }
   0x6   : > { %s659_s30 = sadd.s32 4294967294, %s887_s28   ;;  %s28_s7 = sadd.s32 1, %s879_s26 }
   0x7   : > { %p29_p0 = scmp.ge.s32.totalorder %s28_s7, 4  ;;  %s31_s8 = sadd.s32 1, %s883_s27 }
   0x8   : > { %p199_p1 = scmp.ne.s32.totalorder %s867_s23, %s863_s22  ;;  %p200_p2 = scmp.eq.s32.totalorder %s658_s29, 7 }
   0x9   : > { %s1105_s7 = smov (%p29_p0, %s28_s7), 0  ;;  %s1107_s8 = smov (!%p29_p0, %s31_s8), %s883_s27 }
   0xa   : > { %1091 = sst [smem:[#allocation6_spill]] %s1105_s7  ;;  %p974_p3 = por %p200_p2, %p199_p1 }
   0xb   : > { %p205_p4 = scmp.ne.s32.totalorder %s863_s22, %s859_s21  ;;  %p33_p5 = scmp.ge.s32.totalorder %s1107_s8, 2 }
   0xc   : > { %p206_p6 = scmp.eq.s32.totalorder %s659_s30, 7  ;;  %p662_p7 = scmp.ge.s32.totalorder %s887_s28, 1 }
   0xd   : > { %p265_p8 = scmp.lt.s32.totalorder %s887_s28, 9  ;;  %s1109_s8 = smov (%p33_p5, %s1107_s8), 0 }
   0xe   : > { %1093 = sst [smem:[#allocation7_spill]] %s1109_s8  ;;  %p984_p9 = por %p206_p6, %p205_p4 }
   0xf   : > { %p266_p10 = pnand %p662_p7, %p265_p8  ;;  %s186_s11 = ssub.s32 %s883_s27, %s1109_s8 }
  0x10   : > { %s189_s12 = sadd.s32 1, %s867_s23  ;;  %p187_p11 = scmp.eq.s32.totalorder %s186_s11, 0 }
  0x11   : > { %269 = sbr.rel (%p266_p10) target bundleno = 840 (0x348), region = 44  ;;  %s1088_s14 = sand.u32 (!%p266_p10), 1, %s863_s22  }
  0x12   : > { %s992_s13 = scalar_select %p187_p11, %s867_s23, %s189_s12  }
  0x13   : > { %p317_p12 = scmp.lt.s32.totalorder (!%p266_p10), %s871_s24, 3  ;;  %s998_s15 = sshll.u32 (!%p266_p10), %s1088_s14, 3 }
  0x14   : > { %p313_p13 = scmp.lt.s32.totalorder (!%p266_p10), %s875_s25, 1  ;;  %p702_p0 = scmp.ne.s32.totalorder (!%p266_p10), %s871_s24, 0 }
  0x16   : > { %s1002_s16 = scalar_select %p317_p12, %s871_s24, 3  ;;  %vm355_vm0 = vcmask 261120   ;;  %vm438_vm1 = vcmask 64512   ;;  %v432_v15 = vlaneseq  ;;  %v889_v18 = vmov -1e+30  }
  0x17   : > { %s314_s17 = scalar_select %p313_p13, %s875_s25, 1  ;;  %vm474_vm3 = vcmask 1043456  }
  0x18   : > { %s707_s18 = sshll.u32 %s1002_s16, 4  ;;  %v433_v16 = vshrl.u32 %v432_v15, 7  ;;  %v435_v17 = vand.u32 127, %v432_v15  ;;  %s671_s14 = sshll.u32 %s1002_s16, 2 }
  0x19   : > { %s321_s29 = scalar_lea.vmem %s1081_s1, %s707_s18  ;;  %s326_s12 = scalar_lea.vmem %s1082_s2, %s707_s18 }
  0x1a   : > { %v711_v0 = vld [vmem:[%s321_s29 + $0x8] sm:$0xff]  ;;  %s664_s8 = sshll.u32 %s314_s17, 3  ;;  %v710_v2 = vld [vmem:[%s321_s29] sm:$0xff]  ;;  %vm436_vm2 = vcmp.le.s32.totalorder %v435_v17, %v433_v16  ;;  %s335_s19 = scalar_lea.vmem %s1084_s4, %s671_s14 }
  0x1b   : > { %v713_v1 = vld [vmem:[%s326_s12 + $0x8] sm:$0xff]  ;;  %s316_s27 = scalar_lea.vmem %s1080_s0, %s664_s8  ;;  %365 = vmatpush.bf16.msra.mxu0 %v711_v0  ;;  %v712_v3 = vld [vmem:[%s326_s12] sm:$0xff]  ;;  %s331_s8 = scalar_lea.vmem %s1083_s3, %s707_s18  ;;  %v437_v19 = vsel %vm436_vm2, 0.0, %v889_v18 }
  0x1c   : > { %394 = vmatpush.bf16.msra.mxu1 %v713_v1  ;;  %v337_v4 = vld [vmem:[%s316_s27] sm:$0xff]  ;;  %v715_v13 = vld [vmem:[%s331_s8 + $0x8] sm:$0xff]  ;;  %s312_s16 = scalar_lea.vmem [#allocation2], %s998_s15 }
  0x1d   : > { %v338_v5 = vpack.c.bf16 %v337_v4, %v337_v4  ;;  %423 = vmatpush.bf16.msra.mxu2 %v715_v13  ;;  %v714_v14 = vld [vmem:[%s331_s8] sm:$0xff] }
  0x1e   : > { %v492_v33 = vld [vmem:[%s335_s19] sm:$0xf] }
  0x1f   : > { %366 = vmatpush.bf16.msra.mxu0 %v710_v2  ;;  %v497_v34 = vsel %vm474_vm3, %v492_v33, 0 }
  0x20   : > { %395 = vmatpush.bf16.msra.mxu1 %v712_v3 }
  0x21   : > { %424 = vmatpush.bf16.msra.mxu2 %v714_v14 }
  0x22   : > { %680 = vmatmul.msk.bf16.vlgmr.msra.gmra.mxu0 %vm355_vm0, %v338_v5 }
  0x23   : > { %689 = vmatmul.msk.bf16.vlgmr.msra.gmra.mxu1 %vm355_vm0, %v338_v5 }
  0x24   : > { %698 = vmatmul.msk.bf16.vlgmr.msra.gmra.mxu2 %vm355_vm0, %v338_v5  ;;  %506 = vmatpush.bf16.msrb.mxu1 %v497_v34 }
  0x9f   : > { %v368_v6 = vpop.f32.mrf.mxu0 }
  0xa0   : > { %v397_v7 = vpop.f32.mrf.mxu1  ;;  %v430_v10 = vpack.c.bf16 %v368_v6, %v368_v6 }
  0xa1   : > { %v431_v8 = vpack.c.bf16 %v397_v7, %v397_v7 }
  0xa3   : > { %v443_v9 = vsel %vm438_vm1, %v431_v8, 0 }
  0xa4   : > { %452 = vmatpush.bf16.xpose.msra.mxu3 %v443_v9 }
  0xa7   : > { %v370_v11 = vpop.f32.mrf.mxu0  ;;  %v426_v24 = vpop.f32.mrf.mxu2 }
  0xa8   : > { %v399_v12 = vpop.f32.mrf.mxu1  ;;  %v470_v25 = vpack.c.bf16 %v426_v24, %v426_v24 }
  0xaa   : > { %v476_v27 = vsel %vm474_vm3, %v470_v25, 0 }
  0xab   : > { %699 = vmatmul.msk.bf16.vlgmr.msra.gmra.mxu3 %vm438_vm1, %v430_v10  ;;  %485 = vmatpush.bf16.msrb.mxu0 %v476_v27 }
  0xaf   : > { %v428_v30 = vpop.f32.mrf.mxu2 }
 0x12e   : > { %v454_v20 = vpop.f32.mrf.mxu3 }
 0x12f   : > { %v455_v21 = vadd.f32 %v454_v20, %v437_v19 }
 0x131   : > { %v458_v22 = vsel %vm438_vm1, %v455_v21, -inf }
 0x132   : > { %459 = vmax.xlane.f32.xlu0 %v458_v22 }
 0x136   : > { %v456_v23 = vpop.f32.mrf.mxu3 }
 0x1a5   : > { %v460_v26 = vpop.xlane.xlu0 %459 }
 0x1a6   : > { %v461_v28 = vsub.f32 %v455_v21, %v460_v26 }
 0x1a8   : > { %v462_v29 = vmul.f32 1.442695, %v461_v28 }
 0x1aa   : > { %788 = vpow2.f32 %v462_v29 }
 0x1b0   : > { %v789_v31 = vpop.eup %788 }
 0x1b1   : > { %v464_v32 = vsel %vm438_vm1, %v789_v31, 0.0 }
 0x1b2   : > { %465 = vadd.xlane.f32.xlu0 %v464_v32 }
 0x225   : > { %v466_v35 = vpop.xlane.xlu0 %465 }
 0x226   : > { %790 = vrcp.f32 %v466_v35 }
 0x22c   : > { %v791_v36 = vpop.eup %790 }
 0x22d   : > { %v468_v37 = vmul.f32 %v791_v36, %v789_v31 }
 0x22f   : > { %v469_v38 = vpack.c.bf16 %v468_v37, %v468_v37 }
 0x231   : > { %700 = vmatmul.msk.bf16.vlgmr.msrb.gmra.mxu0 %vm438_vm1, %v469_v38 }
 0x2ae   : > { %v487_v39 = vpop.f32.mrf.mxu0 }
 0x2af   : > { %v491_v40 = vpack.c.bf16 %v487_v39, %v487_v39 }
 0x2b1   : > { %701 = vmatmul.msk.bf16.vlgmr.msrb.gmra.mxu1 %vm438_vm1, %v491_v40 }
 0x2b6   : > { %v489_v41 = vpop.f32.mrf.mxu0 }
 0x32e   : > { %v508_v42 = vpop.f32.mrf.mxu1 }
 0x332   : > { %515 = sbr.rel (%p702_p0) target bundleno = 825 (0x339), region = 48 }
 0x336   : > { %v510_v43 = vpop.f32.mrf.mxu1 }
 0x337   : > { %v792_v44 = vld [vmem:[%s1085_s5] ss:$0 sm:$0xff] }
 0x338   : > { %520 = vst [vmem:[%s312_s16] sm:$0xff] %v792_v44 }
 0x339 PF: > { %s704_s30 = sshll.u32 %s875_s25, 3  ;;  %s537_s15 = sshll.u32 %s312_s16, 4  ;;  %s538_s15 = int_to_ptr.vmem [resolvable:$true] %s537_s15 }
 0x33a   : > { %s535_s27 = scalar_lea.hbm %s1086_s6, %s704_s30  ;;  %s1095_s7 = sand.u32 1, %s863_s22  }
 0x33b   : > { %s539_s24 = sshll.u32 %s535_s27, 4  ;;  %s525_s8 = scalar_lea.sflag [#allocation3], %s1095_s7  ;;  %s540_s24 = int_to_ptr.hbm [resolvable:$true] %s539_s24 }
 0x33c   : > { %s807_s14 = sshra.s32 %s540_s24, 4  ;;  %s813_s19 = scalar_lea.hbm %s1086_s6, 16  ;;  %s808_s14 = int_to_ptr.hbm [resolvable:$true] %s807_s14 }
 0x33d   : > { %s809_s17 = scalar_lea.hbm %s808_s14, 8  ;;  %p814_p5 = scmp.lt.s32.totalorder %s808_s14, %s1086_s6 }
 0x33e   : > { %p810_p1 = scmp.ne.s32.totalorder %s808_s14, %s809_s17  ;;  %p815_p6 = scmp.lt.s32.totalorder %s813_s19, %s809_s17 }
 0x33f   : > { %v521_v45 = vld [vmem:[%s312_s16] sm:$0xff] }
 0x340   : > { %v522_v46 = vadd.f32 %v521_v45, %v508_v42  ;;  %p811_p2 = pnand %p810_p1, %p974_p3  ;;  %p816_p7 = por %p815_p6, %p814_p5 }
 0x342   : > { %523 = vst [vmem:[%s312_s16] sm:$0xff] %v522_v46  ;;  %p812_p4 = pneg %p811_p2 }
 0x344   : > { %p817_p8 = pnand %p816_p7, %p812_p4 }
 0x346   : > { %820 = shalt.err (!%p817_p8)
}
 0x347   : > { %716 = dma.vmem_to_hbm [thread:$0]  (%p974_p3), %s538_s15, 128, %s540_s24, %s525_s8  }
 0x348 PF: > { %p722_p10 = scmp.ge.s32.totalorder %s887_s28, 2  ;;  %s551_s16 = sand.u32 1, %s859_s21  }
 0x349   : > { %s552_s30 = scalar_lea.sflag [#allocation3], %s551_s16 }
 0x34a   : > { %p719_p11 = pnand %p722_p10, %p984_p9 }
 0x34c   : > { %p720_p12 = pneg %p719_p11 }
 0x34e   : > { %854 = dma.done.wait (%p720_p12), %s552_s30, 128  }
 0x34f   : > { %856 = vsyncadd (%p720_p12), %s552_s30, 4294967168  ;;  %s19_s28 = sadd.s32 1, %s887_s28   ;;  %s1096_s25 = sld [smem:[#allocation5_spill]] }
 0x350   : > { %p16_p13 = scmp.ge.s32.totalorder %s19_s28, 10   ;;  %s1097_s9 = sld [smem:[#allocation6_spill]] }
 0x351   : > { %s1098_s27 = sld [smem:[#allocation7_spill]]  ;;  %s1099_s21 = smov %s863_s22 }
 0x352   : > { %s1100_s22 = smov %s867_s23  ;;  %s1101_s23 = smov %s992_s13 }
 0x353   : > { %s1102_s24 = smov %s879_s26  ;;  %18 = sbr.rel (!%p16_p13) target bundleno = 5 (0x5), region = 95 }
 0x356   : > { %s1103_s26 = smov %s1097_s9 }
 0x358   :  { %558 = vsyncpa [#allocation3], 1 }
 0x359   :  { %560 = vsyncpa [#allocation3 + $0x1], 1 }

</bundles_post_ra>
